<compile_context>
chip_gen: v6e
topology: v6e:2x2x1
jax: 0.10.0
libtpu: 0.0.40
codegen_flags: <defaults>
</compile_context>

<pallas_src>
import jax
import jax.numpy as jnp
from jax.experimental import pallas as pl
from jax.experimental.pallas import tpu as pltpu

LANE = 128
SUBLANE = 8


def _round_up(v, m):
    return (v + m - 1) // m * m


def _lut_generator_kernel(x_ref, w1t_ref, b1_ref, w2t_ref, weights_ref, luts_ref):
    # First linear (with bias).  Recomputed per D tile: (TB,F)@(F,RP) is a few
    # hundred flops, so recompute is far cheaper than carrying a cross-iteration
    # scratch dependency, and it keeps both grid axes megacore-parallel.
    w = jnp.dot(x_ref[...], w1t_ref[...],
                preferred_element_type=jnp.float32) + b1_ref[...]
    # Idempotent write: identical value for every D tile of this batch tile.
    weights_ref[...] = w.astype(weights_ref.dtype)
    # Second linear (no bias): (TB,RP)@(RP,TN) -> (TB,TN), lane-dense output.
    luts_ref[...] = jnp.dot(
        w, w2t_ref[...], preferred_element_type=jnp.float32
    ).astype(luts_ref.dtype)


def prepare_lut_generator_params(w1, b1, w2):
    """One-time parameter preparation (hoist out of the per-call path).

    w1: (n_ranks, n_feats), b1: (n_ranks,), w2: (D, n_ranks)  [PyTorch layouts].
    Returns row-major matmul layouts with the rank axis padded to a multiple of
    8 (sublane) and the LUT width padded to a multiple of 128 (lane).  Padding
    is zero-filled, so results are unchanged; it is sliced off in the wrapper.
    """
    R, F = w1.shape
    D = w2.shape[0]
    RP = _round_up(R, SUBLANE)
    DP = _round_up(D, LANE)
    w1t = jnp.zeros((F, RP), jnp.float32).at[:, :R].set(w1.T.astype(jnp.float32))
    b1p = jnp.zeros((1, RP), jnp.float32).at[:, :R].set(
        b1.astype(jnp.float32).reshape(1, R))
    w2t = jnp.zeros((RP, DP), jnp.float32).at[:R, :D].set(w2.T.astype(jnp.float32))
    return {"w1t": w1t, "b1p": b1p, "w2t": w2t}


def _choose_tile_n(DP, RP, TB, F, budget_bytes):
    """Largest lane-multiple D tile that divides DP and fits the VMEM budget."""
    per_col = 2 * 4 * (RP + TB)                      # dbl-buffered w2t + luts cols
    fixed = 4 * (2 * TB * F + 2 * F * RP + 2 * RP + 2 * TB * RP)
    cap_cols = max((budget_bytes - fixed) // per_col, LANE)
    cap = (cap_cols // LANE) * LANE
    if cap >= DP:
        return DP                                    # single D step
    best = LANE
    for m in range(1, DP // LANE + 1):
        tn = m * LANE
        if tn > cap:
            break
        if DP % tn == 0:
            best = tn
    return best


def lut_generator_forward(x, w1t, b1p, w2t, n_colors, n_vertices, n_ranks):
    """x: (B, n_feats); w1t/b1p/w2t: outputs of prepare_lut_generator_params."""
    B, F = x.shape
    RP = w1t.shape[1]
    DP = w2t.shape[1]
    D = n_colors * n_vertices ** n_colors
    R = n_ranks

    # Batch tile: minimize padding for small batches, MXU-friendly cap otherwise.
    B8 = _round_up(B, SUBLANE)
    TB = B8 if B8 <= 256 else 256
    BP = _round_up(B, TB)

    # Per-generation VMEM budget for the double-buffered working set.
    try:
        phys_vmem = int(pltpu.get_tpu_info().vmem_capacity_bytes)
    except Exception:
        phys_vmem = 64 * 1024 * 1024                 # conservative (v7x per-TC)
    budget = min(phys_vmem // 3, 32 * 1024 * 1024)
    TN = _choose_tile_n(DP, RP, TB, F, budget)

    n_b = BP // TB
    n_d = DP // TN

    # Only x genuinely depends on the call; pad it if needed.
    xp = x.astype(jnp.float32)
    if BP != B:
        xp = jnp.zeros((BP, F), jnp.float32).at[:B, :].set(xp)

    footprint = 4 * (2 * TB * F + 2 * F * RP + 2 * RP
                     + 2 * RP * TN + 2 * TB * RP + 2 * TB * TN)
    vmem_limit = int(min(max(footprint + (4 << 20), 16 << 20), 40 << 20))

    cost = pl.CostEstimate(
        flops=2 * BP * F * RP * n_d + 2 * BP * RP * DP,
        transcendentals=0,
        bytes_accessed=4 * (BP * F + F * RP + RP + RP * DP + BP * RP + BP * DP),
    )

    weights_pad, luts_pad = pl.pallas_call(
        _lut_generator_kernel,
        out_shape=(
            jax.ShapeDtypeStruct((BP, RP), jnp.float32),
            jax.ShapeDtypeStruct((BP, DP), jnp.float32),
        ),
        grid_spec=pltpu.PrefetchScalarGridSpec(
            num_scalar_prefetch=0,
            grid=(n_b, n_d),
            in_specs=[
                pl.BlockSpec((TB, F), lambda b, d: (b, 0)),    # x batch tile
                pl.BlockSpec((F, RP), lambda b, d: (0, 0)),    # W1t (whole, tiny)
                pl.BlockSpec((1, RP), lambda b, d: (0, 0)),    # bias row
                pl.BlockSpec((RP, TN), lambda b, d: (0, d)),   # W2t D tile
            ],
            out_specs=(
                # weights: same block for all d; written (idempotently) each step
                pl.BlockSpec((TB, RP), lambda b, d: (b, 0)),
                # luts: lane-dense (TB, TN) tile per grid step
                pl.BlockSpec((TB, TN), lambda b, d: (b, d)),
            ),
        ),
        compiler_params=pltpu.CompilerParams(
            dimension_semantics=("parallel", "parallel"),
            vmem_limit_bytes=vmem_limit,
        ),
        cost_estimate=cost,
    )(xp, w1t, b1p, w2t)

    # Glue: strip padding and reshape luts to (B, n_colors, V, ..., V).
    weights = weights_pad[:B, :R]
    luts = luts_pad[:B, :D].reshape((B, n_colors) + (n_vertices,) * n_colors)
    return weights, luts


def make_params(key, n_colors, n_vertices, n_feats, n_ranks):
    """Deterministic parameters following LUTGenerator.init_weights():
      - weights_generator.bias = ones
      - basis_luts_bank.weight = identity_lut.t()
    weights_generator.weight is drawn from a fixed PRNG key (synthetic, no ckpt).
    """
    k1, _ = jax.random.split(key)
    bound = 1.0 / jnp.sqrt(jnp.float32(n_feats))
    w1 = jax.random.uniform(
        k1, (n_ranks, n_feats), jnp.float32, minval=-bound, maxval=bound
    )
    b1 = jnp.ones((n_ranks,), jnp.float32)

    grids = jnp.meshgrid(
        *[jnp.arange(n_vertices, dtype=jnp.float32) for _ in range(n_colors)],
        indexing="ij",
    )
    identity = jnp.stack(grids, axis=0) / float(n_vertices - 1)  # (C, V, ..., V)
    identity = jnp.flip(identity, axis=0)
    zeros = jnp.zeros(
        (n_ranks - 1, n_colors) + (n_vertices,) * n_colors, jnp.float32
    )
    identity_lut = jnp.concatenate([identity[None], zeros], axis=0).reshape(
        n_ranks, -1
    )  # (n_ranks, n_colors * V**n_colors)

    w2 = identity_lut.T  # basis_luts_bank.weight: (D, n_ranks)
    return w1, b1, w2


def reference_forward(x, w1, b1, w2, n_colors, n_vertices):
    weights = x @ w1.T + b1
    luts = weights @ w2.T
    luts = luts.reshape((x.shape[0], -1) + (n_vertices,) * n_colors)
    return weights, luts


if __name__ == "__main__":
    # Small shapes consistent with the module.
    n_colors = 3
    n_vertices = 8
    n_feats = 32
    n_ranks = 8
    batch = 2

    key = jax.random.PRNGKey(0)
    kx, kp = jax.random.split(key)
    x = jax.random.normal(kx, (batch, n_feats), jnp.float32)

    w1, b1, w2 = make_params(kp, n_colors, n_vertices, n_feats, n_ranks)

    # One-time parameter prep (hoisted out of the per-call path).
    prepped = jax.block_until_ready(prepare_lut_generator_params(w1, b1, w2))

    weights, luts = lut_generator_forward(
        x, prepped["w1t"], prepped["b1p"], prepped["w2t"],
        n_colors, n_vertices, n_ranks,
    )
    jax.block_until_ready((weights, luts))

    # Correctness check against a pure-JAX reference of the PyTorch forward.
    ref_w, ref_l = reference_forward(x, w1, b1, w2, n_colors, n_vertices)
    assert weights.shape == (batch, n_ranks)
    assert luts.shape == (batch, n_colors) + (n_vertices,) * n_colors
    assert jnp.allclose(weights, ref_w, atol=1e-5, rtol=1e-5)
    assert jnp.allclose(luts, ref_l, atol=1e-5, rtol=1e-5)

    print("KERNEL_OK")
</pallas_src>

<mosaic_0001>
module attributes {stable_mosaic.version = 11 : i64} {
  func.func @_lut_generator_kernel(%arg0: i32, %arg1: i32, %arg2: memref<8x32xf32, #tpu.memory_space<vmem>>, %arg3: memref<32x8xf32, #tpu.memory_space<vmem>>, %arg4: memref<1x8xf32, #tpu.memory_space<vmem>>, %arg5: memref<8x1536xf32, #tpu.memory_space<vmem>>, %arg6: memref<8x8xf32, #tpu.memory_space<vmem>>, %arg7: memref<8x1536xf32, #tpu.memory_space<vmem>>) attributes {dimension_semantics = [#tpu.dimension_semantics<parallel>, #tpu.dimension_semantics<parallel>], iteration_bounds = array<i64: 1, 1>, scalar_prefetch = 0 : i64, scratch_operands = 0 : i64, tpu.core_type = #tpu.core_type<tc>, window_params = [{transform_indices = @transform_0, window_bounds = array<i64: 8, 32>}, {pipeline_mode = #tpu.pipeline_mode<synchronous>, transform_indices = @transform_1, window_bounds = array<i64: 32, 8>}, {pipeline_mode = #tpu.pipeline_mode<synchronous>, transform_indices = @transform_2, window_bounds = array<i64: 1, 8>}, {transform_indices = @transform_3, window_bounds = array<i64: 8, 1536>}, {transform_indices = @transform_4, window_bounds = array<i64: 8, 8>}, {transform_indices = @transform_5, window_bounds = array<i64: 8, 1536>}]} {
    %c0 = arith.constant 0 : index
    %c0_0 = arith.constant 0 : index
    %0 = vector.load %arg2[%c0, %c0_0] : memref<8x32xf32, #tpu.memory_space<vmem>>, vector<8x32xf32>
    %c0_1 = arith.constant 0 : index
    %c0_2 = arith.constant 0 : index
    %1 = vector.load %arg3[%c0_1, %c0_2] : memref<32x8xf32, #tpu.memory_space<vmem>>, vector<32x8xf32>
    %cst = arith.constant dense<0.000000e+00> : vector<8x8xf32>
    %2 = tpu.matmul %0, %1, %cst {dimension_numbers = #tpu.dot_dimension_numbers<[1], [0], [0], [1], [0, 0, 1, 1], [], []>} : vector<8x32xf32>, vector<32x8xf32>, vector<8x8xf32> -> vector<8x8xf32>
    %c0_3 = arith.constant 0 : index
    %c0_4 = arith.constant 0 : index
    %3 = vector.load %arg4[%c0_3, %c0_4] : memref<1x8xf32, #tpu.memory_space<vmem>>, vector<1x8xf32>
    %4 = vector.broadcast %3 : vector<1x8xf32> to vector<8x8xf32>
    %5 = arith.addf %2, %4 : vector<8x8xf32>
    %c0_5 = arith.constant 0 : index
    %c0_6 = arith.constant 0 : index
    %6 = vector.load %arg6[%c0_5, %c0_6] : memref<8x8xf32, #tpu.memory_space<vmem>>, vector<8x8xf32>
    tpu.vector_store %arg6[%c0_5, %c0_6], %5 {strides = array<i32>} : memref<8x8xf32, #tpu.memory_space<vmem>>, vector<8x8xf32>,
    %c0_7 = arith.constant 0 : index
    %c0_8 = arith.constant 0 : index
    %7 = vector.load %arg5[%c0_7, %c0_8] : memref<8x1536xf32, #tpu.memory_space<vmem>>, vector<8x1536xf32>
    %cst_9 = arith.constant dense<0.000000e+00> : vector<8x1536xf32>
    %8 = tpu.matmul %5, %7, %cst_9 {dimension_numbers = #tpu.dot_dimension_numbers<[1], [0], [0], [1], [0, 0, 1, 1], [], []>} : vector<8x8xf32>, vector<8x1536xf32>, vector<8x1536xf32> -> vector<8x1536xf32>
    %c0_10 = arith.constant 0 : index
    %c0_11 = arith.constant 0 : index
    %9 = vector.load %arg7[%c0_10, %c0_11] : memref<8x1536xf32, #tpu.memory_space<vmem>>, vector<8x1536xf32>
    tpu.vector_store %arg7[%c0_10, %c0_11], %8 {strides = array<i32>} : memref<8x1536xf32, #tpu.memory_space<vmem>>, vector<8x1536xf32>,
    return
  }
  func.func @transform_0(%arg0: i32, %arg1: i32) -> (i32, i32) {
    %c0_i32 = arith.constant 0 : i32
    %c0_i32_0 = arith.constant 0 : i32
    return %arg0, %c0_i32 : i32, i32
  }
  func.func @transform_1(%arg0: i32, %arg1: i32) -> (i32, i32) {
    %c0_i32 = arith.constant 0 : i32
    %c0_i32_0 = arith.constant 0 : i32
    %c0_i32_1 = arith.constant 0 : i32
    return %c0_i32, %c0_i32_0 : i32, i32
  }
  func.func @transform_2(%arg0: i32, %arg1: i32) -> (i32, i32) {
    %c0_i32 = arith.constant 0 : i32
    %c0_i32_0 = arith.constant 0 : i32
    %c0_i32_1 = arith.constant 0 : i32
    return %c0_i32, %c0_i32_0 : i32, i32
  }
  func.func @transform_3(%arg0: i32, %arg1: i32) -> (i32, i32) {
    %c0_i32 = arith.constant 0 : i32
    %c0_i32_0 = arith.constant 0 : i32
    return %c0_i32, %arg1 : i32, i32
  }
  func.func @transform_4(%arg0: i32, %arg1: i32) -> (i32, i32) {
    %c0_i32 = arith.constant 0 : i32
    %c0_i32_0 = arith.constant 0 : i32
    return %arg0, %c0_i32 : i32, i32
  }
  func.func @transform_5(%arg0: i32, %arg1: i32) -> (i32, i32) {
    %c0_i32 = arith.constant 0 : i32
    return %arg0, %arg1 : i32, i32
  }
}

</mosaic_0001>

<bundles_post_ra>
// kernel: tpu_custom_call.1
= control target key start
LH: loop header
LB: loop body
LE: loop exit
PB: predicated region body
PF: predicated region fallthrough
CT: control target
= control target key end

     0   :  { %11 = vsyncpa [#allocation3], 0  ;;  %s767_s0 = inlined_call_operand.vmem [shape: f32[8,32], index: 0, kind: input, shape index: {}]   ;;  %s768_s1 = inlined_call_operand.vmem [shape: f32[32,8], index: 1, kind: input, shape index: {}]   ;;  %s769_s2 = inlined_call_operand.vmem [shape: f32[1,8], index: 2, kind: input, shape index: {}]   ;;  %s770_s3 = inlined_call_operand.hbm [shape: f32[8,1536], index: 3, kind: input, shape index: {}]   ;;  %s771_s4 = inlined_call_operand.hbm [shape: f32[8,8], index: 4, kind: output, shape index: {0}]   ;;  %s772_s5 = inlined_call_operand.hbm [shape: f32[8,1536], index: 5, kind: output, shape index: {1}]  }
   0x1   :  { %12 = vsyncpa [#allocation4], 0 }
   0x2   :  { %13 = vsyncpa [#allocation7], 0  ;;  %s698_s18 = smov [#allocation2]  }
   0x3   :  { %s26_s19 = sshll.u32 %s698_s18, 4  ;;  %s27_s19 = int_to_ptr.vmem [resolvable:$true] %s26_s19 }
   0x4   :  { %s640_s20 = scalar_lea.vmem %s27_s19, 1536  ;;  %p645_p1 = scmp.lt.s32.totalorder %s27_s19, %s27_s19 }
   0x5   :  { %p641_p0 = scmp.ne.s32.totalorder %s27_s19, %s640_s20  ;;  %p646_p2 = scmp.lt.s32.totalorder %s640_s20, %s640_s20 }
   0x7   :  { %p647_p3 = por %p646_p2, %p645_p1 }
   0x9   :  { %p648_p4 = pnand %p647_p3, %p641_p0 }
   0xb   :  { %651 = shalt.err (!%p648_p4)
}
   0xc   :  { %29 = dma.hbm_to_vmem [thread:$0]  %s770_s3, 1536, %s27_s19, [#allocation3]  }
   0xd   :  { %692 = dma.done.wait [#allocation3], 1536  }
   0xe   :  { %693 = vsyncadd [#allocation3], 4294965760  ;;  %v699_v0 = vmov 0.0   ;;  %vm700_vm0 = vmmov 0   ;;  %v37_v1 = vld [vmem:[%s768_s1 + $0x18] sm:$0xff]  ;;  %v36_v2 = vld [vmem:[%s768_s1 + $0x10] sm:$0xff] }
   0xf   :  { %616 = vmatprep.subr.mxu0 %v699_v0  ;;  %624 = vmatprep.mubr.msk.f32.mxu0 %vm700_vm0, %v699_v0  ;;  %v35_v3 = vld [vmem:[%s768_s1 + $0x8] sm:$0xff]  ;;  %v34_v4 = vld [vmem:[%s768_s1] sm:$0xff]  ;;  %vm45_vm1 = vcmask 261120   ;;  %v128_v7 = vld [vmem:[#allocation2 + $0x38] sm:$0xff]  ;;  %vm119_vm2 = vcmask 64512  }
  0x10   :  { %200 = vmatprep.mubr.f32.mxu1 %v699_v0  ;;  %617 = vmatpush3.msra.mxu0 %v37_v1  ;;  %v33_v5 = vld [vmem:[%s767_s0] sm:$0xff]  ;;  %v122_v6 = vld [vmem:[#allocation2 + $0x8] sm:$0xff]  ;;  %v127_v9 = vld [vmem:[#allocation2 + $0x30] sm:$0xff]  ;;  %s701_s0 = smov [#allocation5]  }
  0x11   :  { %618 = vmatprep.subr.mxu0 %v699_v0  ;;  %166 = vmatprep.subr.mxu1 %v122_v6  ;;  %v121_v8 = vld [vmem:[#allocation2] sm:$0xff]  ;;  %v124_v10 = vld [vmem:[#allocation2 + $0x18] sm:$0xff]  ;;  %v123_v15 = vld [vmem:[#allocation2 + $0x10] sm:$0xff] }
  0x12   :  { %619 = vmatpush3.msra.mxu0 %v36_v2  ;;  %167 = vmatpush1.msra.mxu1 %v121_v8  ;;  %v132_v11 = vld [vmem:[#allocation2 + $0x58] sm:$0xff]  ;;  %v603_v12 = vld [vmem:[%s769_s2] ss:$0 sm:$0xff]  ;;  %v126_v17 = vld [vmem:[#allocation2 + $0x28] sm:$0xff]  ;;  %s580_s2 = sshll.u32 %s701_s0, 4  ;;  %s581_s2 = int_to_ptr.vmem [resolvable:$true] %s580_s2 }
  0x13   :  { %620 = vmatprep.subr.mxu0 %v699_v0  ;;  %237 = vmatprep.subr.mxu1 %v124_v10  ;;  %v131_v18 = vld [vmem:[#allocation2 + $0x50] sm:$0xff]  ;;  %v125_v19 = vld [vmem:[#allocation2 + $0x20] sm:$0xff]  ;;  %v130_v20 = vld [vmem:[#allocation2 + $0x48] sm:$0xff]  ;;  %s652_s8 = scalar_lea.vmem %s581_s2, 128  ;;  %p657_p6 = scmp.lt.s32.totalorder %s581_s2, %s581_s2 }
  0x14   :  { %621 = vmatpush3.msra.mxu0 %v35_v3  ;;  %v129_v21 = vld [vmem:[#allocation2 + $0x40] sm:$0xff]  ;;  %p653_p5 = scmp.ne.s32.totalorder %s581_s2, %s652_s8  ;;  %p658_p7 = scmp.lt.s32.totalorder %s652_s8, %s652_s8 }
  0x15   :  { %622 = vmatprep.subr.mxu0 %v699_v0 }
  0x16   :  { %623 = vmatpush3.msra.mxu0 %v34_v4  ;;  %p659_p8 = por %p658_p7, %p657_p6 }
  0x17   :  { %625 = vmatmul.mubr.msk.f32.vlgmr.msra.gmra.mxu0 %vm45_vm1, %v33_v5  ;;  %379 = vmatprep.subr.mxu0 %v128_v7 }
  0x18   :  { %413 = vmatprep.mubr.f32.mxu0 %v699_v0  ;;  %380 = vmatpush1.msra.mxu0 %v127_v9  ;;  %p660_p9 = pnand %p659_p8, %p653_p5 }
  0x19   :  { %521 = vmatprep.subr.mxu0 %v132_v11 }
  0xd7   :  { %v115_v13 = vpop.f32.mrf.mxu0 }
  0xd8   :  { %v116_v14 = vadd.f32 %v603_v12, %v115_v13 }
  0xd9   :  { %v626_v16 = vpop.f32.mrf.mxu0 }
  0xda   :  { %605 = vmatmul.mubr.msk.f32.vlgmr.msra.gmra.mxu1 %vm119_vm2, %v116_v14  ;;  %120 = vst.msk [vmem:[#allocation5] sm:$0xff] %vm119_vm2, %v116_v14  ;;  %608 = vmatmul.mubr.msk.f32.vlgmr.msra.gmra.mxu0 %vm119_vm2, %v116_v14 }
  0xdb   :  { %238 = vmatpush1.msra.mxu1 %v123_v15  ;;  %271 = vmatprep.mubr.f32.mxu1 %v699_v0 }
  0xdc   :  { %308 = vmatprep.subr.mxu1 %v126_v17  ;;  %522 = vmatpush1.msra.mxu0 %v131_v18 }
  0xdd   :  { %555 = vmatprep.mubr.f32.mxu0 %v699_v0 }
  0xde   :  { %606 = vmatmul.mubr.msk.f32.vlgmr.msra.gmra.mxu1 %vm119_vm2, %v116_v14  ;;  %610 = vmatmul.mubr.msk.f32.vlgmr.msra.gmra.mxu0 %vm119_vm2, %v116_v14 }
  0xdf   :  { %309 = vmatpush1.msra.mxu1 %v125_v19  ;;  %342 = vmatprep.mubr.f32.mxu1 %v699_v0 }
  0xe0   :  { %450 = vmatprep.subr.mxu1 %v130_v20 }
  0xe2   :  { %607 = vmatmul.mubr.msk.f32.vlgmr.msra.gmra.mxu1 %vm119_vm2, %v116_v14 }
  0xe3   :  { %451 = vmatpush1.msra.mxu1 %v129_v21  ;;  %484 = vmatprep.mubr.f32.mxu1 %v699_v0 }
  0xe6   :  { %609 = vmatmul.mubr.msk.f32.vlgmr.msra.gmra.mxu1 %vm119_vm2, %v116_v14 }
  0xe7   :  { %663 = shalt.err (!%p660_p9)
}
  0xe8   :  { %583 = dma.vmem_to_hbm [thread:$0]  %s581_s2, 128, %s771_s4, [#allocation4]  }
  0xe9   :  { %s702_s4 = smov [#allocation6]  }
  0xea   :  { %s590_s11 = sshll.u32 %s702_s4, 4  ;;  %s591_s11 = int_to_ptr.vmem [resolvable:$true] %s590_s11 }
  0xeb   :  { %s672_s12 = scalar_lea.vmem %s591_s11, 1536  ;;  %p677_p11 = scmp.lt.s32.totalorder %s591_s11, %s591_s11 }
  0xec   :  { %p673_p10 = scmp.ne.s32.totalorder %s591_s11, %s672_s12  ;;  %p678_p12 = scmp.lt.s32.totalorder %s672_s12, %s672_s12 }
  0xee   :  { %p679_p13 = por %p678_p12, %p677_p11 }
  0xf0   :  { %p680_p0 = pnand %p679_p13, %p673_p10 }
 0x19a   :  { %v202_v22 = vpop.f32.mrf.mxu1  ;;  %v415_v23 = vpop.f32.mrf.mxu0 }
 0x19b   :  { %562 = vst [vmem:[#allocation6] sm:$0xff] %v202_v22  ;;  %568 = vst [vmem:[#allocation6 + $0x30] sm:$0xff] %v415_v23 }
 0x19c   :  { %v204_v24 = vpop.f32.mrf.mxu1  ;;  %v417_v25 = vpop.f32.mrf.mxu0 }
 0x19d   :  { %563 = vst [vmem:[#allocation6 + $0x8] sm:$0xff] %v204_v24  ;;  %569 = vst [vmem:[#allocation6 + $0x38] sm:$0xff] %v417_v25 }
 0x19e   :  { %v273_v26 = vpop.f32.mrf.mxu1  ;;  %v557_v27 = vpop.f32.mrf.mxu0 }
 0x19f   :  { %564 = vst [vmem:[#allocation6 + $0x10] sm:$0xff] %v273_v26  ;;  %572 = vst [vmem:[#allocation6 + $0x50] sm:$0xff] %v557_v27 }
 0x1a0   :  { %v275_v28 = vpop.f32.mrf.mxu1  ;;  %v559_v29 = vpop.f32.mrf.mxu0 }
 0x1a1   :  { %565 = vst [vmem:[#allocation6 + $0x18] sm:$0xff] %v275_v28  ;;  %573 = vst [vmem:[#allocation6 + $0x58] sm:$0xff] %v559_v29 }
 0x1a2   :  { %v344_v30 = vpop.f32.mrf.mxu1 }
 0x1a3   :  { %566 = vst [vmem:[#allocation6 + $0x20] sm:$0xff] %v344_v30 }
 0x1a4   :  { %v346_v31 = vpop.f32.mrf.mxu1 }
 0x1a5   :  { %567 = vst [vmem:[#allocation6 + $0x28] sm:$0xff] %v346_v31 }
 0x1a6   :  { %v486_v32 = vpop.f32.mrf.mxu1 }
 0x1a7   :  { %570 = vst [vmem:[#allocation6 + $0x40] sm:$0xff] %v486_v32 }
 0x1a8   :  { %v488_v33 = vpop.f32.mrf.mxu1 }
 0x1a9   :  { %571 = vst [vmem:[#allocation6 + $0x48] sm:$0xff] %v488_v33 }
 0x1aa   :  { %683 = shalt.err (!%p680_p0)
}
 0x1ab   :  { %593 = dma.vmem_to_hbm [thread:$0]  %s591_s11, 1536, %s772_s5, [#allocation7]  }
 0x1ac   :  { %694 = dma.done.wait [#allocation4], 128  }
 0x1ad   :  { %695 = vsyncadd [#allocation4], 4294967168 }
 0x1ae   :  { %696 = dma.done.wait [#allocation7], 1536  }
 0x1af   :  { %697 = vsyncadd [#allocation7], 4294965760 }
 0x1b0   :  { %600 = vsyncpa [#allocation3], 1 }
 0x1b1   :  { %601 = vsyncpa [#allocation4], 1 }
 0x1b2   :  { %602 = vsyncpa [#allocation7], 1 }

</bundles_post_ra>
